<compile_context>
chip_gen: v7x
topology: tpu7x:2x2x1
jax: 0.10.0
libtpu: 0.0.40
codegen_flags: <defaults>
</compile_context>

<pallas_src>
import jax
import jax.numpy as jnp
from jax.experimental import pallas as pl
from jax.experimental.pallas import tpu as pltpu


def _round_up(n: int, m: int) -> int:
    return ((n + m - 1) // m) * m


def _default_layer2_dtype():
    """bf16 on bf16-native generations (v6e / v7x), f32 otherwise (v5e & older)."""
    try:
        kind = jax.devices()[0].device_kind.lower()
    except Exception:
        return jnp.float32
    if ("v6" in kind) or ("v7" in kind) or ("tpu7" in kind):
        return jnp.bfloat16
    return jnp.float32


def dqn_kernel(x_ref, w1_ref, b1_ref, w2_ref, b2_ref, w3_ref, b3_ref, o_ref):
    """One batch tile: o = fc3(relu(fc2(relu(fc1(x))))), batch-major throughout."""
    x = x_ref[...]                                              # (tile_b, 3) f32

    # Layer 1 on the MXU ((tile_b,3) @ (3,32)); fused bias + ReLU on the VPU.
    h1 = jnp.dot(x, w1_ref[...], preferred_element_type=jnp.float32)
    h1 = jnp.maximum(h1 + b1_ref[...], 0.0)                     # (tile_b, 32) f32

    # Layer 2 ((tile_b,32) @ (32,32)); operands in w2's dtype (bf16 on v6e/v7x),
    # accumulation stays f32.
    h2 = jnp.dot(h1.astype(w2_ref.dtype), w2_ref[...],
                 preferred_element_type=jnp.float32)
    h2 = jnp.maximum(h2 + b2_ref[...], 0.0)                     # (tile_b, 32) f32

    # Layer 3 ((tile_b,32) @ (32,3)) + bias; store in natural (tile_b, 3) layout.
    out = jnp.dot(h2, w3_ref[...], preferred_element_type=jnp.float32) + b3_ref[...]
    o_ref[...] = out.astype(o_ref.dtype)


def dqn_forward(x, params, *, tile_b=4096, layer2_dtype=None):
    """x: (B, 3) float32, params in PyTorch layout ((out,in) weights, (out,) biases).

    Returns (B, 3) = fc3(relu(fc2(relu(fc1(x))))).
    """
    w1, b1, w2, b2, w3, b3 = params
    B, in_dim = x.shape
    out_dim = w3.shape[0]

    if layer2_dtype is None:
        layer2_dtype = _default_layer2_dtype()

    # One-time tiny (<=32x32) param re-layout to (in, out) / (1, out); negligible.
    w1t = w1.T.astype(jnp.float32)              # (3, 32)   K=3 layer stays f32
    w2t = w2.T.astype(layer2_dtype)             # (32, 32)  bf16 on v6e/v7x
    w3t = w3.T.astype(jnp.float32)              # (32, 3)
    b1r = b1.reshape(1, -1).astype(jnp.float32)
    b2r = b2.reshape(1, -1).astype(jnp.float32)
    b3r = b3.reshape(1, -1).astype(jnp.float32)

    # Batch tile: multiple of 8 sublanes; at least 2 grid steps whenever the
    # batch allows it (so dimension_semantics=("parallel",) can split across
    # the two v7x TensorCores); never larger than the (padded) batch.
    tile_b = max(8, (int(tile_b) // 8) * 8)
    if B >= 16:
        tile_b = min(tile_b, _round_up((B + 1) // 2, 8))
    else:
        tile_b = min(tile_b, _round_up(B, 8))
    b_pad = _round_up(B, tile_b)

    x_in = x.astype(jnp.float32)
    if b_pad != B:                               # pad only when B % tile_b != 0
        x_in = jnp.pad(x_in, ((0, b_pad - B), (0, 0)))

    const = lambda a: pl.BlockSpec(a.shape, lambda i: (0, 0))

    out = pl.pallas_call(
        dqn_kernel,
        out_shape=jax.ShapeDtypeStruct((b_pad, out_dim), jnp.float32),
        grid=(b_pad // tile_b,),
        in_specs=[
            pl.BlockSpec((tile_b, in_dim), lambda i: (i, 0)),    # x batch tile
            const(w1t), const(b1r),                              # weights/biases:
            const(w2t), const(b2r),                              # constant index ->
            const(w3t), const(b3r),                              # VMEM resident
        ],
        out_specs=pl.BlockSpec((tile_b, out_dim), lambda i: (i, 0)),
        compiler_params=pltpu.CompilerParams(
            dimension_semantics=("parallel",),      # megacore split on v7x
            vmem_limit_bytes=48 * 1024 * 1024,      # < v7x 64 MiB/TC, < v5e/v6e 128 MiB
        ),
    )(x_in, w1t, b1r, w2t, b2r, w3t, b3r)

    return out[:B] if b_pad != B else out


def init_params(key):
    """nn.Linear-style init: U(-1/sqrt(fan_in), 1/sqrt(fan_in)), PyTorch layout."""
    def linear(k, fan_in, fan_out):
        kw, kb = jax.random.split(k)
        bound = fan_in ** -0.5
        w = jax.random.uniform(kw, (fan_out, fan_in), jnp.float32, -bound, bound)
        b = jax.random.uniform(kb, (fan_out,), jnp.float32, -bound, bound)
        return w, b

    k1, k2, k3 = jax.random.split(key, 3)
    w1, b1 = linear(k1, 3, 32)
    w2, b2 = linear(k2, 32, 32)
    w3, b3 = linear(k3, 32, 3)
    return (w1, b1, w2, b2, w3, b3)


if __name__ == "__main__":
    key = jax.random.PRNGKey(0)
    pkey, xkey = jax.random.split(key)

    params = init_params(pkey)
    B = 256
    x = jax.random.normal(xkey, (B, 3), jnp.float32)

    # Pure-JAX reference (PyTorch semantics: y = x @ W.T + b).
    w1, b1, w2, b2, w3, b3 = params
    ref = jnp.maximum(x @ w1.T + b1, 0.0)
    ref = jnp.maximum(ref @ w2.T + b2, 0.0)
    ref = ref @ w3.T + b3

    # 1) Full-f32 path (valid on every generation); the default tile clamps to
    #    128 rows here -> a 2-step grid that exercises the pipeline.
    fwd_f32 = jax.jit(lambda xx, pp: dqn_forward(xx, pp, layer2_dtype=jnp.float32))
    out_f32 = jax.block_until_ready(fwd_f32(x, params))
    assert out_f32.shape == (B, 3)
    assert jnp.allclose(out_f32, ref, atol=1e-3, rtol=1e-3)

    # 2) Auto-dtype path (bf16 layer-2 operands on v6e/v7x, identical f32 on v5e).
    fwd_auto = jax.jit(lambda xx, pp: dqn_forward(xx, pp))
    out_auto = jax.block_until_ready(fwd_auto(x, params))
    assert out_auto.shape == (B, 3)
    assert jnp.allclose(out_auto, ref, atol=1e-1, rtol=1e-1)

    print("KERNEL_OK")
</pallas_src>

<mosaic_0001>
module attributes {stable_mosaic.version = 11 : i64} {
  func.func @dqn_kernel(%arg0: i32, %arg1: memref<128x3xf32, #tpu.memory_space<vmem>>, %arg2: memref<3x32xf32, #tpu.memory_space<vmem>>, %arg3: memref<1x32xf32, #tpu.memory_space<vmem>>, %arg4: memref<32x32xf32, #tpu.memory_space<vmem>>, %arg5: memref<1x32xf32, #tpu.memory_space<vmem>>, %arg6: memref<32x3xf32, #tpu.memory_space<vmem>>, %arg7: memref<1x3xf32, #tpu.memory_space<vmem>>, %arg8: memref<128x3xf32, #tpu.memory_space<vmem>>) attributes {dimension_semantics = [#tpu.dimension_semantics<parallel>], iteration_bounds = array<i64: 2>, scalar_prefetch = 0 : i64, scratch_operands = 0 : i64, tpu.core_type = #tpu.core_type<tc>, window_params = [{transform_indices = @transform_0, window_bounds = array<i64: 128, 3>}, {pipeline_mode = #tpu.pipeline_mode<synchronous>, transform_indices = @transform_1, window_bounds = array<i64: 3, 32>}, {pipeline_mode = #tpu.pipeline_mode<synchronous>, transform_indices = @transform_2, window_bounds = array<i64: 1, 32>}, {pipeline_mode = #tpu.pipeline_mode<synchronous>, transform_indices = @transform_3, window_bounds = array<i64: 32, 32>}, {pipeline_mode = #tpu.pipeline_mode<synchronous>, transform_indices = @transform_4, window_bounds = array<i64: 1, 32>}, {pipeline_mode = #tpu.pipeline_mode<synchronous>, transform_indices = @transform_5, window_bounds = array<i64: 32, 3>}, {pipeline_mode = #tpu.pipeline_mode<synchronous>, transform_indices = @transform_6, window_bounds = array<i64: 1, 3>}, {transform_indices = @transform_7, window_bounds = array<i64: 128, 3>}]} {
    %c0 = arith.constant 0 : index
    %c0_0 = arith.constant 0 : index
    %0 = vector.load %arg1[%c0, %c0_0] : memref<128x3xf32, #tpu.memory_space<vmem>>, vector<128x3xf32>
    %c0_1 = arith.constant 0 : index
    %c0_2 = arith.constant 0 : index
    %1 = vector.load %arg2[%c0_1, %c0_2] : memref<3x32xf32, #tpu.memory_space<vmem>>, vector<3x32xf32>
    %cst = arith.constant dense<0.000000e+00> : vector<128x32xf32>
    %2 = tpu.matmul %0, %1, %cst {dimension_numbers = #tpu.dot_dimension_numbers<[1], [0], [0], [1], [0, 0, 1, 1], [], []>} : vector<128x3xf32>, vector<3x32xf32>, vector<128x32xf32> -> vector<128x32xf32>
    %c0_3 = arith.constant 0 : index
    %c0_4 = arith.constant 0 : index
    %3 = vector.load %arg3[%c0_3, %c0_4] : memref<1x32xf32, #tpu.memory_space<vmem>>, vector<1x32xf32>
    %4 = vector.broadcast %3 : vector<1x32xf32> to vector<128x32xf32>
    %5 = arith.addf %2, %4 : vector<128x32xf32>
    %cst_5 = arith.constant 0.000000e+00 : f32
    %6 = vector.broadcast %cst_5 : f32 to vector<128x32xf32>
    %7 = arith.maximumf %5, %6 : vector<128x32xf32>
    %c0_6 = arith.constant 0 : index
    %c0_7 = arith.constant 0 : index
    %8 = vector.load %arg4[%c0_6, %c0_7] : memref<32x32xf32, #tpu.memory_space<vmem>>, vector<32x32xf32>
    %cst_8 = arith.constant dense<0.000000e+00> : vector<128x32xf32>
    %9 = tpu.matmul %7, %8, %cst_8 {dimension_numbers = #tpu.dot_dimension_numbers<[1], [0], [0], [1], [0, 0, 1, 1], [], []>} : vector<128x32xf32>, vector<32x32xf32>, vector<128x32xf32> -> vector<128x32xf32>
    %c0_9 = arith.constant 0 : index
    %c0_10 = arith.constant 0 : index
    %10 = vector.load %arg5[%c0_9, %c0_10] : memref<1x32xf32, #tpu.memory_space<vmem>>, vector<1x32xf32>
    %11 = vector.broadcast %10 : vector<1x32xf32> to vector<128x32xf32>
    %12 = arith.addf %9, %11 : vector<128x32xf32>
    %cst_11 = arith.constant 0.000000e+00 : f32
    %13 = vector.broadcast %cst_11 : f32 to vector<128x32xf32>
    %14 = arith.maximumf %12, %13 : vector<128x32xf32>
    %c0_12 = arith.constant 0 : index
    %c0_13 = arith.constant 0 : index
    %15 = vector.load %arg6[%c0_12, %c0_13] : memref<32x3xf32, #tpu.memory_space<vmem>>, vector<32x3xf32>
    %cst_14 = arith.constant dense<0.000000e+00> : vector<128x3xf32>
    %16 = tpu.matmul %14, %15, %cst_14 {dimension_numbers = #tpu.dot_dimension_numbers<[1], [0], [0], [1], [0, 0, 1, 1], [], []>} : vector<128x32xf32>, vector<32x3xf32>, vector<128x3xf32> -> vector<128x3xf32>
    %c0_15 = arith.constant 0 : index
    %c0_16 = arith.constant 0 : index
    %17 = vector.load %arg7[%c0_15, %c0_16] : memref<1x3xf32, #tpu.memory_space<vmem>>, vector<1x3xf32>
    %18 = vector.broadcast %17 : vector<1x3xf32> to vector<128x3xf32>
    %19 = arith.addf %16, %18 : vector<128x3xf32>
    %c0_17 = arith.constant 0 : index
    %c0_18 = arith.constant 0 : index
    %20 = vector.load %arg8[%c0_17, %c0_18] : memref<128x3xf32, #tpu.memory_space<vmem>>, vector<128x3xf32>
    tpu.vector_store %arg8[%c0_17, %c0_18], %19 {strides = array<i32>} : memref<128x3xf32, #tpu.memory_space<vmem>>, vector<128x3xf32>,
    return
  }
  func.func @transform_0(%arg0: i32) -> (i32, i32) {
    %c0_i32 = arith.constant 0 : i32
    %c0_i32_0 = arith.constant 0 : i32
    return %arg0, %c0_i32 : i32, i32
  }
  func.func @transform_1(%arg0: i32) -> (i32, i32) {
    %c0_i32 = arith.constant 0 : i32
    %c0_i32_0 = arith.constant 0 : i32
    %c0_i32_1 = arith.constant 0 : i32
    return %c0_i32, %c0_i32_0 : i32, i32
  }
  func.func @transform_2(%arg0: i32) -> (i32, i32) {
    %c0_i32 = arith.constant 0 : i32
    %c0_i32_0 = arith.constant 0 : i32
    %c0_i32_1 = arith.constant 0 : i32
    return %c0_i32, %c0_i32_0 : i32, i32
  }
  func.func @transform_3(%arg0: i32) -> (i32, i32) {
    %c0_i32 = arith.constant 0 : i32
    %c0_i32_0 = arith.constant 0 : i32
    %c0_i32_1 = arith.constant 0 : i32
    return %c0_i32, %c0_i32_0 : i32, i32
  }
  func.func @transform_4(%arg0: i32) -> (i32, i32) {
    %c0_i32 = arith.constant 0 : i32
    %c0_i32_0 = arith.constant 0 : i32
    %c0_i32_1 = arith.constant 0 : i32
    return %c0_i32, %c0_i32_0 : i32, i32
  }
  func.func @transform_5(%arg0: i32) -> (i32, i32) {
    %c0_i32 = arith.constant 0 : i32
    %c0_i32_0 = arith.constant 0 : i32
    %c0_i32_1 = arith.constant 0 : i32
    return %c0_i32, %c0_i32_0 : i32, i32
  }
  func.func @transform_6(%arg0: i32) -> (i32, i32) {
    %c0_i32 = arith.constant 0 : i32
    %c0_i32_0 = arith.constant 0 : i32
    %c0_i32_1 = arith.constant 0 : i32
    return %c0_i32, %c0_i32_0 : i32, i32
  }
  func.func @transform_7(%arg0: i32) -> (i32, i32) {
    %c0_i32 = arith.constant 0 : i32
    %c0_i32_0 = arith.constant 0 : i32
    return %arg0, %c0_i32 : i32, i32
  }
}

</mosaic_0001>

<bundles_post_ra>
// kernel: _lambda_.1
= control target key start
LH: loop header
LB: loop body
LE: loop exit
PB: predicated region body
PF: predicated region fallthrough
CT: control target
= control target key end

     0   :  { %s1301_s24 = smov 0   ;;  %s1461_s0 = inlined_call_operand.vmem [shape: f32[256,3], index: 0, kind: input, shape index: {}]   ;;  %s1462_s1 = inlined_call_operand.vmem [shape: f32[3,32], index: 1, kind: input, shape index: {}]   ;;  %s1463_s2 = inlined_call_operand.vmem [shape: f32[1,32], index: 2, kind: input, shape index: {}]   ;;  %s1464_s3 = inlined_call_operand.vmem [shape: f32[32,32], index: 3, kind: input, shape index: {}]   ;;  %s1465_s4 = inlined_call_operand.vmem [shape: f32[1,32], index: 4, kind: input, shape index: {}]   ;;  %s1466_s5 = inlined_call_operand.vmem [shape: f32[32,3], index: 5, kind: input, shape index: {}]   ;;  %s1467_s6 = inlined_call_operand.vmem [shape: f32[1,3], index: 6, kind: input, shape index: {}]   ;;  %s1468_s7 = inlined_call_operand.vmem [shape: f32[256,3], index: 7, kind: output, shape index: {}]  }
   0x1 LB: > { %s1017_s25 = sadd.s32 4294967295, %s1259_s24   ;;  %p1021_p0 = scmp.ge.s32.totalorder %s1259_s24, 1  ;;  %s1259_s24 = sphi %s1301_s24, %s17_s24  }
   0x2   : > { %p238_p1 = scmp.lt.s32.totalorder %s1259_s24, 3 }
   0x4   : > { %p239_p2 = pnand %p1021_p0, %p238_p1 }
   0x5   : > { %v298_v0 = vld [vmem:[%s1462_s1] sm:$0x7] (!%p239_p2)  ;;  %vm355_vm0 = vcmask (!%p239_p2), 1042432   ;;  %s1022_s28 = sshll.u32 (!%p239_p2), %s1017_s25, 4  ;;  %v521_v2 = vld [vmem:[%s1464_s3 + $0x8] sm:$0xff] (!%p239_p2)  ;;  %vm306_vm1 = vcmask (!%p239_p2), 23552  }
   0x6   : > { %242 = sbr.rel (%p239_p2) target bundleno = 698 (0x2ba), region = 48  ;;  %v520_v1 = vld [vmem:[%s1464_s3] sm:$0xff] (!%p239_p2)  ;;  %1137 = vmatprep.subr.msk.mxu0 (!%p239_p2), %vm355_vm0, %v298_v0  ;;  %p271_p3 = scmp.lt.s32.totalorder (!%p239_p2), %s1022_s28, 31  ;;  %1243 = vmatprep.subr.msk.mxu1 (!%p239_p2), %vm355_vm0, %v298_v0  ;;  %v522_v4 = vld [vmem:[%s1464_s3 + $0x10] sm:$0xff] (!%p239_p2)  ;;  %v523_v5 = vld [vmem:[%s1464_s3 + $0x18] sm:$0xff] (!%p239_p2)  ;;  %vm531_vm2 = vcmask (!%p239_p2), 261120  }
   0x7   : > { %1138 = vmatpush3.msk.msra.mxu0 (!%p239_p2), %vm355_vm0, %v298_v0  ;;  %1244 = vmatpush3.msk.msra.mxu1 (!%p239_p2), %vm355_vm0, %v298_v0  ;;  %v1227_v3 = vpack.c.bf16 (!%p239_p2), %v521_v2, %v520_v1  ;;  %v1231_v10 = vpack.c.bf16 (!%p239_p2), %v523_v5, %v522_v4  ;;  %v741_v23 = vld [vmem:[%s1466_s5] sm:$0xff] (!%p239_p2)  ;;  %v742_v24 = vld [vmem:[%s1466_s5 + $0x8] sm:$0xff] (!%p239_p2)  ;;  %v743_v25 = vld [vmem:[%s1466_s5 + $0x10] sm:$0xff] (!%p239_p2) }
   0x8   : > { %v1235_v26 = vpack.c.bf16 (!%p239_p2), %v742_v24, %v741_v23  ;;  %v744_v27 = vld [vmem:[%s1466_s5 + $0x18] sm:$0xff] (!%p239_p2)  ;;  %v1026_v29 = vld [vmem:[%s1463_s2] ss:$0 sm:$0xff] (!%p239_p2) }
   0x9   : > { %1228 = vmatprep.subr.bf16.mxu1 (!%p239_p2), %v1227_v3  ;;  %v1239_v28 = vpack.c.bf16 (!%p239_p2), %v744_v27, %v743_v25 }
   0xa   : > { %1236 = vmatprep.subr.bf16.mxu0 (!%p239_p2), %v1235_v26 }
   0xd   : > { %s1470_s28 = smov (!%p271_p3, %s1022_s28), 31 }
   0xe   : > { %s1023_s10 = sshll.u32 %s1470_s28, 3 }
   0xf   : > { %s1326_s13 = scalar_lea.vmem %s1461_s0, %s1023_s10  ;;  %s1424_s14 = scalar_lea.vmem %s1468_s7, %s1023_s10 }
  0x10   : > { %v282_v6 = vld [vmem:[%s1326_s13] sm:$0xff]  ;;  %v283_v7 = vld [vmem:[%s1326_s13 + $0x8] sm:$0xff]  ;;  %v284_v8 = vld [vmem:[%s1326_s13 + $0x10] sm:$0xff] }
  0x11   : > { %1139 = vmatprep.mubr.msk.f32.mxu0 %vm306_vm1, %v282_v6  ;;  %v290_v9 = vld [vmem:[%s1326_s13 + $0x40] sm:$0xff]  ;;  %v285_v11 = vld [vmem:[%s1326_s13 + $0x18] sm:$0xff]  ;;  %v291_v12 = vld [vmem:[%s1326_s13 + $0x48] sm:$0xff] }
  0x12   : > { %1140 = vmatmul.mubr.msk.f32.vlgmr.msra.gmra.mrb[0].mxu0 %vm306_vm1, %v283_v7  ;;  %1151 = vmatprep.mubr.msk.f32.mxu1 %vm306_vm1, %v290_v9  ;;  %v292_v13 = vld [vmem:[%s1326_s13 + $0x50] sm:$0xff]  ;;  %v286_v14 = vld [vmem:[%s1326_s13 + $0x20] sm:$0xff]  ;;  %v293_v15 = vld [vmem:[%s1326_s13 + $0x58] sm:$0xff] }
  0x13   : > { %1142 = vmatprep.mubr.msk.f32.mxu0 %vm306_vm1, %v284_v8  ;;  %1152 = vmatmul.mubr.msk.f32.vlgmr.msra.gmra.mrb[0].mxu1 %vm306_vm1, %v291_v12  ;;  %v294_v16 = vld [vmem:[%s1326_s13 + $0x60] sm:$0xff]  ;;  %v287_v17 = vld [vmem:[%s1326_s13 + $0x28] sm:$0xff]  ;;  %v288_v18 = vld [vmem:[%s1326_s13 + $0x30] sm:$0xff] }
  0x14   : > { %1154 = vmatprep.mubr.msk.f32.mxu1 %vm306_vm1, %v292_v13  ;;  %1230 = vmatpush3.bf16.msra.mxu1 %v1227_v3  ;;  %v295_v19 = vld [vmem:[%s1326_s13 + $0x68] sm:$0xff]  ;;  %v296_v20 = vld [vmem:[%s1326_s13 + $0x70] sm:$0xff]  ;;  %v289_v21 = vld [vmem:[%s1326_s13 + $0x38] sm:$0xff] }
  0x15   : > { %1232 = vmatprep.subr.bf16.mxu1 %v1231_v10  ;;  %v297_v22 = vld [vmem:[%s1326_s13 + $0x78] sm:$0xff]  ;;  %1238 = vmatpush3.bf16.msra.mxu0 %v1235_v26 }
  0x16   : > { %1143 = vmatmul.mubr.msk.f32.gmra.mrb[2].mxu0 %vm306_vm1, %v285_v11  ;;  %1240 = vmatprep.subr.bf16.mxu0 %v1239_v28 }
  0x17   : > { %1145 = vmatprep.mubr.msk.f32.mxu0 %vm306_vm1, %v286_v14  ;;  %1155 = vmatmul.mubr.msk.f32.gmra.mrb[2].mxu1 %vm306_vm1, %v293_v15  ;;  %v1044_v14 = vld [vmem:[%s1465_s4] ss:$0 sm:$0xff] }
  0x18   : > { %1157 = vmatprep.mubr.msk.f32.mxu1 %vm306_vm1, %v294_v16  ;;  %1234 = vmatpush3.bf16.msra.mxu1 %v1231_v10 }
  0x19   : > { %1242 = vmatpush3.bf16.msra.mxu0 %v1239_v28 }
  0x1a   : > { %1146 = vmatmul.mubr.msk.f32.gmra.mrb[4].mxu0 %vm306_vm1, %v287_v17 }
  0x1b   : > { %1148 = vmatprep.mubr.msk.f32.mxu0 %vm306_vm1, %v288_v18  ;;  %1158 = vmatmul.mubr.msk.f32.gmra.mrb[4].mxu1 %vm306_vm1, %v295_v19 }
  0x1c   : > { %1160 = vmatprep.mubr.msk.f32.mxu1 %vm306_vm1, %v296_v20 }
  0x1e   : > { %1149 = vmatmul.mubr.msk.f32.gmra.mrb[6].mxu0 %vm306_vm1, %v289_v21 }
  0x1f   : > { %1161 = vmatmul.mubr.msk.f32.gmra.mrb[6].mxu1 %vm306_vm1, %v297_v22 }
  0xe5   : > { %v1141_v30 = vpop.f32.mrb[0].mxu0 }
  0xe6   : > { %v431_v31 = vadd.f32 %v1141_v30, %v1026_v29  ;;  %v425_v32 = vpop.f32.mrb[1].mxu0  ;;  %v1153_v34 = vpop.f32.mrb[0].mxu1 }
  0xe7   : > { %v426_v33 = vadd.f32 %v1026_v29, %v425_v32  ;;  %v465_v35 = vpop.f32.mrb[1].mxu1  ;;  %v471_v1 = vadd.f32 %v1153_v34, %v1026_v29 }
  0xe8   : > { %v505_v38 = vmax.f32 %v431_v31, 0.0  ;;  %v466_v54 = vadd.f32 %v1026_v29, %v465_v35 }
  0xe9   : > { %v504_v36 = vmax.f32 %v426_v33, 0.0  ;;  %v1144_v37 = vpop.f32.mrb[2].mxu0  ;;  %v513_v4 = vmax.f32 %v471_v1, 0.0 }
  0xea   : > { %v441_v39 = vadd.f32 %v1144_v37, %v1026_v29  ;;  %v435_v40 = vpop.f32.mrb[3].mxu0  ;;  %v1156_v42 = vpop.f32.mrb[2].mxu1  ;;  %v512_v62 = vmax.f32 %v466_v54, 0.0 }
  0xeb   : > { %v436_v41 = vadd.f32 %v1026_v29, %v435_v40  ;;  %1171 = vmatprep.mubr.msk.f32.mxu1 %vm531_vm2, %v504_v36  ;;  %v475_v43 = vpop.f32.mrb[3].mxu1  ;;  %v481_v5 = vadd.f32 %v1156_v42, %v1026_v29 }
  0xec   : > { %1172 = vmatmul.mubr.msk.f32.vlgmr.msra.gmra.mrb[8].mxu1 %vm531_vm2, %v505_v38  ;;  %v507_v46 = vmax.f32 %v441_v39, 0.0  ;;  %v476_v63 = vadd.f32 %v1026_v29, %v475_v43 }
  0xed   : > { %v506_v44 = vmax.f32 %v436_v41, 0.0  ;;  %v1147_v45 = vpop.f32.mrb[4].mxu0  ;;  %v515_v8 = vmax.f32 %v481_v5, 0.0 }
  0xee   : > { %v451_v47 = vadd.f32 %v1147_v45, %v1026_v29  ;;  %v445_v48 = vpop.f32.mrb[5].mxu0  ;;  %v1159_v50 = vpop.f32.mrb[4].mxu1  ;;  %v514_v2 = vmax.f32 %v476_v63, 0.0  ;;  %v1061_v63 = vld [vmem:[%s1467_s6] ss:$0 sm:$0xff] }
  0xef   : > { %v446_v49 = vadd.f32 %v1026_v29, %v445_v48  ;;  %1174 = vmatprep.mubr.msk.f32.mxu1 %vm531_vm2, %v506_v44  ;;  %v485_v51 = vpop.f32.mrb[5].mxu1  ;;  %v491_v9 = vadd.f32 %v1159_v50, %v1026_v29 }
  0xf0   : > { %1175 = vmatmul.mubr.msk.f32.gmra.mrb[10].mxu1 %vm531_vm2, %v507_v46  ;;  %v509_v55 = vmax.f32 %v451_v47, 0.0  ;;  %v486_v3 = vadd.f32 %v1026_v29, %v485_v51 }
  0xf1   : > { %v508_v52 = vmax.f32 %v446_v49, 0.0  ;;  %v1150_v53 = vpop.f32.mrb[6].mxu0  ;;  %v517_v11 = vmax.f32 %v491_v9, 0.0 }
  0xf2   : > { %v461_v56 = vadd.f32 %v1150_v53, %v1026_v29  ;;  %v455_v57 = vpop.f32.mrb[7].mxu0  ;;  %v1162_v59 = vpop.f32.mrb[6].mxu1  ;;  %v516_v6 = vmax.f32 %v486_v3, 0.0 }
  0xf3   : > { %v456_v58 = vadd.f32 %v1026_v29, %v455_v57  ;;  %1177 = vmatprep.mubr.msk.f32.mxu1 %vm531_vm2, %v508_v52  ;;  %v495_v60 = vpop.f32.mrb[7].mxu1  ;;  %v501_v12 = vadd.f32 %v1162_v59, %v1026_v29 }
  0xf4   : > { %1178 = vmatmul.mubr.msk.f32.gmra.mrb[12].mxu1 %vm531_vm2, %v509_v55  ;;  %v511_v0 = vmax.f32 %v461_v56, 0.0  ;;  %v496_v7 = vadd.f32 %v1026_v29, %v495_v60 }
  0xf5   : > { %v510_v61 = vmax.f32 %v456_v58, 0.0  ;;  %v519_v13 = vmax.f32 %v501_v12, 0.0 }
  0xf6   : > { %v518_v10 = vmax.f32 %v496_v7, 0.0 }
  0xf7   : > { %1180 = vmatprep.mubr.msk.f32.mxu1 %vm531_vm2, %v510_v61 }
  0xf8   : > { %1181 = vmatmul.mubr.msk.f32.gmra.mrb[14].mxu1 %vm531_vm2, %v511_v0 }
  0xf9   : > { %1183 = vmatprep.mubr.msk.f32.mxu1 %vm531_vm2, %v512_v62 }
  0xfc   : > { %1184 = vmatmul.mubr.msk.f32.gmra.mrb[16].mxu1 %vm531_vm2, %v513_v4 }
  0xfd   : > { %1186 = vmatprep.mubr.msk.f32.mxu1 %vm531_vm2, %v514_v2 }
 0x100   : > { %1187 = vmatmul.mubr.msk.f32.gmra.mrb[18].mxu1 %vm531_vm2, %v515_v8 }
 0x101   : > { %1189 = vmatprep.mubr.msk.f32.mxu1 %vm531_vm2, %v516_v6 }
 0x104   : > { %1190 = vmatmul.mubr.msk.f32.gmra.mrb[20].mxu1 %vm531_vm2, %v517_v11 }
 0x105   : > { %1192 = vmatprep.mubr.msk.f32.mxu1 %vm531_vm2, %v518_v10 }
 0x108   : > { %1193 = vmatmul.mubr.msk.f32.gmra.mrb[22].mxu1 %vm531_vm2, %v519_v13 }
 0x1bf   : > { %v1173_v15 = vpop.f32.mrb[8].mxu1 }
 0x1c0   : > { %v652_v16 = vadd.f32 %v1173_v15, %v1044_v14  ;;  %v646_v17 = vpop.f32.mrb[9].mxu1 }
 0x1c1   : > { %v647_v18 = vadd.f32 %v1044_v14, %v646_v17 }
 0x1c2   : > { %v726_v21 = vmax.f32 %v652_v16, 0.0 }
 0x1c3   : > { %v725_v19 = vmax.f32 %v647_v18, 0.0  ;;  %v1176_v20 = vpop.f32.mrb[10].mxu1 }
 0x1c4   : > { %v662_v22 = vadd.f32 %v1176_v20, %v1044_v14  ;;  %v656_v23 = vpop.f32.mrb[11].mxu1 }
 0x1c5   : > { %v657_v24 = vadd.f32 %v1044_v14, %v656_v23  ;;  %1203 = vmatprep.mubr.msk.f32.mxu0 %vm531_vm2, %v725_v19 }
 0x1c6   : > { %1204 = vmatmul.mubr.msk.f32.vlgmr.msra.gmra.mrb[8].mxu0 %vm531_vm2, %v726_v21  ;;  %v728_v27 = vmax.f32 %v662_v22, 0.0 }
 0x1c7   : > { %v727_v25 = vmax.f32 %v657_v24, 0.0  ;;  %v1179_v26 = vpop.f32.mrb[12].mxu1 }
 0x1c8   : > { %v672_v28 = vadd.f32 %v1179_v26, %v1044_v14  ;;  %v666_v29 = vpop.f32.mrb[13].mxu1 }
 0x1c9   : > { %v667_v30 = vadd.f32 %v1044_v14, %v666_v29  ;;  %1206 = vmatprep.mubr.msk.f32.mxu0 %vm531_vm2, %v727_v25 }
 0x1ca   : > { %1207 = vmatmul.mubr.msk.f32.gmra.mrb[10].mxu0 %vm531_vm2, %v728_v27  ;;  %v730_v33 = vmax.f32 %v672_v28, 0.0 }
 0x1cb   : > { %v729_v31 = vmax.f32 %v667_v30, 0.0  ;;  %v1182_v32 = vpop.f32.mrb[14].mxu1 }
 0x1cc   : > { %v682_v34 = vadd.f32 %v1182_v32, %v1044_v14  ;;  %v676_v35 = vpop.f32.mrb[15].mxu1 }
 0x1cd   : > { %v677_v36 = vadd.f32 %v1044_v14, %v676_v35  ;;  %1209 = vmatprep.mubr.msk.f32.mxu0 %vm531_vm2, %v729_v31 }
 0x1ce   : > { %1210 = vmatmul.mubr.msk.f32.gmra.mrb[12].mxu0 %vm531_vm2, %v730_v33  ;;  %v732_v39 = vmax.f32 %v682_v34, 0.0 }
 0x1cf   : > { %v731_v37 = vmax.f32 %v677_v36, 0.0  ;;  %v1185_v38 = vpop.f32.mrb[16].mxu1 }
 0x1d0   : > { %v692_v40 = vadd.f32 %v1185_v38, %v1044_v14  ;;  %v686_v41 = vpop.f32.mrb[17].mxu1 }
 0x1d1   : > { %v687_v42 = vadd.f32 %v1044_v14, %v686_v41  ;;  %1212 = vmatprep.mubr.msk.f32.mxu0 %vm531_vm2, %v731_v37 }
 0x1d2   : > { %1213 = vmatmul.mubr.msk.f32.gmra.mrb[14].mxu0 %vm531_vm2, %v732_v39  ;;  %v734_v45 = vmax.f32 %v692_v40, 0.0 }
 0x1d3   : > { %v733_v43 = vmax.f32 %v687_v42, 0.0  ;;  %v1188_v44 = vpop.f32.mrb[18].mxu1 }
 0x1d4   : > { %v702_v46 = vadd.f32 %v1188_v44, %v1044_v14  ;;  %v696_v47 = vpop.f32.mrb[19].mxu1 }
 0x1d5   : > { %v697_v48 = vadd.f32 %v1044_v14, %v696_v47  ;;  %1215 = vmatprep.mubr.msk.f32.mxu0 %vm531_vm2, %v733_v43 }
 0x1d6   : > { %1216 = vmatmul.mubr.msk.f32.gmra.mrb[16].mxu0 %vm531_vm2, %v734_v45  ;;  %v736_v51 = vmax.f32 %v702_v46, 0.0 }
 0x1d7   : > { %v735_v49 = vmax.f32 %v697_v48, 0.0  ;;  %v1191_v50 = vpop.f32.mrb[20].mxu1 }
 0x1d8   : > { %v712_v52 = vadd.f32 %v1191_v50, %v1044_v14  ;;  %v706_v53 = vpop.f32.mrb[21].mxu1 }
 0x1d9   : > { %v707_v54 = vadd.f32 %v1044_v14, %v706_v53  ;;  %1218 = vmatprep.mubr.msk.f32.mxu0 %vm531_vm2, %v735_v49 }
 0x1da   : > { %1219 = vmatmul.mubr.msk.f32.gmra.mrb[18].mxu0 %vm531_vm2, %v736_v51  ;;  %v738_v57 = vmax.f32 %v712_v52, 0.0 }
 0x1db   : > { %v737_v55 = vmax.f32 %v707_v54, 0.0  ;;  %v1194_v56 = vpop.f32.mrb[22].mxu1 }
 0x1dc   : > { %v722_v58 = vadd.f32 %v1194_v56, %v1044_v14  ;;  %v716_v59 = vpop.f32.mrb[23].mxu1 }
 0x1dd   : > { %v717_v60 = vadd.f32 %v1044_v14, %v716_v59  ;;  %1221 = vmatprep.mubr.msk.f32.mxu0 %vm531_vm2, %v737_v55 }
 0x1de   : > { %1222 = vmatmul.mubr.msk.f32.gmra.mrb[20].mxu0 %vm531_vm2, %v738_v57  ;;  %v740_v62 = vmax.f32 %v722_v58, 0.0 }
 0x1df   : > { %v739_v61 = vmax.f32 %v717_v60, 0.0 }
 0x1e1   : > { %1224 = vmatprep.mubr.msk.f32.mxu0 %vm531_vm2, %v739_v61 }
 0x1e2   : > { %1225 = vmatmul.mubr.msk.f32.gmra.mrb[22].mxu0 %vm531_vm2, %v740_v62 }
 0x299   : > { %v1205_v0 = vpop.f32.mrb[8].mxu0 }
 0x29a   : > { %v872_v1 = vadd.f32 %v1205_v0, %v1061_v63  ;;  %v866_v2 = vpop.f32.mrb[9].mxu0 }
 0x29b   : > { %v867_v3 = vadd.f32 %v1061_v63, %v866_v2 }
 0x29c   : > { %946 = vst.msk [vmem:[%s1424_s14 + $0x8] sm:$0xff] %vm306_vm1, %v872_v1 }
 0x29d   : > { %945 = vst.msk [vmem:[%s1424_s14] sm:$0xff] %vm306_vm1, %v867_v3  ;;  %v1208_v4 = vpop.f32.mrb[10].mxu0 }
 0x29e   : > { %v882_v5 = vadd.f32 %v1208_v4, %v1061_v63  ;;  %v876_v6 = vpop.f32.mrb[11].mxu0 }
 0x29f   : > { %v877_v7 = vadd.f32 %v1061_v63, %v876_v6 }
 0x2a0   : > { %948 = vst.msk [vmem:[%s1424_s14 + $0x18] sm:$0xff] %vm306_vm1, %v882_v5 }
 0x2a1   : > { %947 = vst.msk [vmem:[%s1424_s14 + $0x10] sm:$0xff] %vm306_vm1, %v877_v7  ;;  %v1211_v8 = vpop.f32.mrb[12].mxu0 }
 0x2a2   : > { %v892_v9 = vadd.f32 %v1211_v8, %v1061_v63  ;;  %v886_v10 = vpop.f32.mrb[13].mxu0 }
 0x2a3   : > { %v887_v11 = vadd.f32 %v1061_v63, %v886_v10 }
 0x2a4   : > { %950 = vst.msk [vmem:[%s1424_s14 + $0x28] sm:$0xff] %vm306_vm1, %v892_v9 }
 0x2a5   : > { %949 = vst.msk [vmem:[%s1424_s14 + $0x20] sm:$0xff] %vm306_vm1, %v887_v11  ;;  %v1214_v12 = vpop.f32.mrb[14].mxu0 }
 0x2a6   : > { %v902_v13 = vadd.f32 %v1214_v12, %v1061_v63  ;;  %v896_v14 = vpop.f32.mrb[15].mxu0 }
 0x2a7   : > { %v897_v15 = vadd.f32 %v1061_v63, %v896_v14 }
 0x2a8   : > { %952 = vst.msk [vmem:[%s1424_s14 + $0x38] sm:$0xff] %vm306_vm1, %v902_v13 }
 0x2a9   : > { %951 = vst.msk [vmem:[%s1424_s14 + $0x30] sm:$0xff] %vm306_vm1, %v897_v15  ;;  %v1217_v16 = vpop.f32.mrb[16].mxu0 }
 0x2aa   : > { %v912_v17 = vadd.f32 %v1217_v16, %v1061_v63  ;;  %v906_v18 = vpop.f32.mrb[17].mxu0 }
 0x2ab   : > { %v907_v19 = vadd.f32 %v1061_v63, %v906_v18 }
 0x2ac   : > { %954 = vst.msk [vmem:[%s1424_s14 + $0x48] sm:$0xff] %vm306_vm1, %v912_v17 }
 0x2ad   : > { %953 = vst.msk [vmem:[%s1424_s14 + $0x40] sm:$0xff] %vm306_vm1, %v907_v19  ;;  %v1220_v20 = vpop.f32.mrb[18].mxu0 }
 0x2ae   : > { %v922_v21 = vadd.f32 %v1220_v20, %v1061_v63  ;;  %v916_v22 = vpop.f32.mrb[19].mxu0 }
 0x2af   : > { %v917_v23 = vadd.f32 %v1061_v63, %v916_v22 }
 0x2b0   : > { %956 = vst.msk [vmem:[%s1424_s14 + $0x58] sm:$0xff] %vm306_vm1, %v922_v21 }
 0x2b1   : > { %955 = vst.msk [vmem:[%s1424_s14 + $0x50] sm:$0xff] %vm306_vm1, %v917_v23  ;;  %v1223_v24 = vpop.f32.mrb[20].mxu0 }
 0x2b2   : > { %v932_v25 = vadd.f32 %v1223_v24, %v1061_v63  ;;  %v926_v26 = vpop.f32.mrb[21].mxu0 }
 0x2b3   : > { %v927_v27 = vadd.f32 %v1061_v63, %v926_v26 }
 0x2b4   : > { %958 = vst.msk [vmem:[%s1424_s14 + $0x68] sm:$0xff] %vm306_vm1, %v932_v25 }
 0x2b5   : > { %957 = vst.msk [vmem:[%s1424_s14 + $0x60] sm:$0xff] %vm306_vm1, %v927_v27  ;;  %v1226_v28 = vpop.f32.mrb[22].mxu0 }
 0x2b6   : > { %v942_v29 = vadd.f32 %v1226_v28, %v1061_v63  ;;  %v936_v30 = vpop.f32.mrb[23].mxu0 }
 0x2b7   : > { %v937_v31 = vadd.f32 %v1061_v63, %v936_v30 }
 0x2b8   : > { %960 = vst.msk [vmem:[%s1424_s14 + $0x78] sm:$0xff] %vm306_vm1, %v942_v29 }
 0x2b9   : > { %959 = vst.msk [vmem:[%s1424_s14 + $0x70] sm:$0xff] %vm306_vm1, %v937_v31 }
 0x2ba PF: > { %s17_s24 = sadd.s32 1, %s1259_s24  }
 0x2bb   : > { %p14_p4 = scmp.ge.s32.totalorder %s17_s24, 4  }
 0x2bd   :  { %16 = sbr.rel (!%p14_p4) target bundleno = 1 (0x1), region = 78 }

</bundles_post_ra>
